<compile_context>
chip_gen: v7x
topology: tpu7x:2x2x1
jax: 0.10.0
libtpu: 0.0.40
codegen_flags: <defaults>
</compile_context>

<pallas_src>
import jax
import jax.numpy as jnp
from jax.experimental import pallas as pl
from jax.experimental.pallas import tpu as pltpu

_LANE = 128      # vreg lane width
_SUBLANE = 8     # f32 sublane count


def _round_up(x, m):
    return (x + m - 1) // m * m


def _gelu_exact(x):
    # PyTorch nn.GELU() default: exact erf-based GELU (computed in f32).
    return 0.5 * x * (1.0 + jax.lax.erf(x * 0.7071067811865476))


def embed_fc_kernel(x_ref, w1_ref, b1_ref, w2_ref, b2_ref, o_ref):
    # x_ref : (TILE_N, input_dim)  input dtype (tiled over the grid)
    # w1_ref: (input_dim, emb_dim) compute dtype (resident: block index fixed)
    # b1_ref: (1, emb_dim)         f32
    # w2_ref: (emb_dim, emb_dim)   compute dtype (resident)
    # b2_ref: (1, emb_dim)         f32
    # o_ref : (TILE_N, emb_dim)    out dtype (tiled over the grid)
    x = x_ref[...].astype(w1_ref.dtype)          # VPU cast, hidden under DMA
    h = jnp.dot(x, w1_ref[...], preferred_element_type=jnp.float32)
    h = _gelu_exact(h + b1_ref[...])
    o = jnp.dot(h.astype(w2_ref.dtype), w2_ref[...],
                preferred_element_type=jnp.float32)
    o_ref[...] = (o + b2_ref[...]).astype(o_ref.dtype)


def _vmem_limit_bytes():
    """Generation-aware VMEM cap: ~5/8 of physical, <= 96 MiB."""
    cap = 64 * 1024 * 1024                      # conservative: v7x per-TC VMEM
    try:
        info = pltpu.get_tpu_info()
        cap = int(getattr(info, "vmem_capacity_bytes", cap) or cap)
    except Exception:
        pass
    return min(cap * 5 // 8, 96 * 1024 * 1024)  # v7x -> 40 MiB, v5e/v6e -> 80 MiB


def _pick_tile_n(n, input_dim, emb_dim, x_itemsize, out_itemsize,
                 vmem_limit, resident_bytes, max_tile=1024):
    """Largest 8-multiple row tile that fits VMEM, keeping >=4 grid steps."""
    per_row = 2 * (input_dim * x_itemsize + emb_dim * out_itemsize)  # 2x = double buffer
    avail = vmem_limit - resident_bytes - (4 << 20)                  # compiler headroom
    if avail <= 0:
        t_mem = _SUBLANE
    else:
        t_mem = max(_SUBLANE, (avail // per_row) // _SUBLANE * _SUBLANE)
    t = min(max_tile, t_mem)
    # v7x: the parallel grid axis feeds both TensorCores -> keep several steps.
    t = min(t, max(_SUBLANE, _round_up(pl.cdiv(n, 4), _SUBLANE)))
    t = min(t, _round_up(n, _SUBLANE))
    return int(t)


def prepare_params(w1, b1, w2, b2, compute_dtype=jnp.bfloat16):
    """One-time cast/reshape of the weights (do NOT redo per forward call)."""
    emb_dim = w1.shape[1]
    return (w1.astype(compute_dtype),
            b1.reshape(1, emb_dim).astype(jnp.float32),
            w2.astype(compute_dtype),
            b2.reshape(1, emb_dim).astype(jnp.float32))


def embed_fc(x, params, input_dim, *, out_dtype=None, tile_n=None):
    """Forward pass of EmbedFC: x.view(-1, input_dim) -> Linear -> GELU -> Linear.

    `params` must come from prepare_params (cast/reshape hoisted out of the
    per-call path)."""
    w1_c, b1_2d, w2_c, b2_2d = params
    out_dtype = x.dtype if out_dtype is None else out_dtype
    x2d = x.reshape(-1, input_dim)               # PyTorch x.view(-1, input_dim)
    n = x2d.shape[0]
    emb_dim = w1_c.shape[1]

    w_itemsize = jnp.dtype(w1_c.dtype).itemsize
    x_itemsize = jnp.dtype(x2d.dtype).itemsize
    o_itemsize = jnp.dtype(out_dtype).itemsize

    # Resident VMEM cost of weights/biases (double-buffered by default, tiny).
    resident_bytes = 2 * ((input_dim * emb_dim + emb_dim * emb_dim) * w_itemsize
                          + 2 * emb_dim * 4)

    vmem_limit = _vmem_limit_bytes()
    if tile_n is None:
        tile_n = _pick_tile_n(n, input_dim, emb_dim, x_itemsize, o_itemsize,
                              vmem_limit, resident_bytes)
    else:
        tile_n = min(_round_up(tile_n, _SUBLANE), _round_up(n, _SUBLANE))

    grid = (pl.cdiv(n, tile_n),)                 # ragged last block is masked

    cost = pl.CostEstimate(
        flops=2 * n * (input_dim + emb_dim) * emb_dim,
        transcendentals=n * emb_dim,
        bytes_accessed=(n * input_dim * x_itemsize          # x (streamed as-is)
                        + input_dim * emb_dim * w_itemsize  # w1
                        + emb_dim * emb_dim * w_itemsize    # w2
                        + 2 * emb_dim * 4                   # biases
                        + n * emb_dim * o_itemsize))        # out

    out = pl.pallas_call(
        embed_fc_kernel,
        out_shape=jax.ShapeDtypeStruct((n, emb_dim), out_dtype),
        grid=grid,
        in_specs=[
            # Full K extent (no padding needed even if input_dim % 128 != 0).
            pl.BlockSpec((tile_n, input_dim), lambda i: (i, 0)),
            pl.BlockSpec((input_dim, emb_dim), lambda i: (0, 0)),
            pl.BlockSpec((1, emb_dim), lambda i: (0, 0)),
            pl.BlockSpec((emb_dim, emb_dim), lambda i: (0, 0)),
            pl.BlockSpec((1, emb_dim), lambda i: (0, 0)),
        ],
        out_specs=pl.BlockSpec((tile_n, emb_dim), lambda i: (i, 0)),
        compiler_params=pltpu.CompilerParams(
            dimension_semantics=("parallel",),
            vmem_limit_bytes=vmem_limit,
        ),
        cost_estimate=cost,
    )(x2d, w1_c, b1_2d, w2_c, b2_2d)

    return out


def init_params(key, input_dim, emb_dim, dtype=jnp.float32):
    # Deterministic init mirroring nn.Linear's U(-1/sqrt(fan_in), 1/sqrt(fan_in)).
    k1, k2, k3, k4 = jax.random.split(key, 4)
    bnd1 = 1.0 / jnp.sqrt(input_dim)
    bnd2 = 1.0 / jnp.sqrt(emb_dim)
    w1 = jax.random.uniform(k1, (input_dim, emb_dim), dtype, -bnd1, bnd1)
    b1 = jax.random.uniform(k2, (emb_dim,), dtype, -bnd1, bnd1)
    w2 = jax.random.uniform(k3, (emb_dim, emb_dim), dtype, -bnd2, bnd2)
    b2 = jax.random.uniform(k4, (emb_dim,), dtype, -bnd2, bnd2)
    return w1, b1, w2, b2


if __name__ == "__main__":
    input_dim = 32
    emb_dim = 128
    key = jax.random.PRNGKey(0)
    kx, kp = jax.random.split(key)

    # e.g. a (2, 4, 32) input -> view(-1, 32) gives N = 8 rows
    x = jax.random.normal(kx, (2, 4, input_dim), dtype=jnp.float32)
    w1, b1, w2, b2 = init_params(kp, input_dim, emb_dim)

    # One-time param preparation (hoisted out of the per-call path).
    params = prepare_params(w1, b1, w2, b2, compute_dtype=jnp.bfloat16)

    out = embed_fc(x, params, input_dim)
    out = jax.block_until_ready(out)

    # Reference check in plain f32 JAX; kernel uses bf16 weights with f32
    # accumulation, so tolerance is widened accordingly.
    x2d = x.reshape(-1, input_dim)
    ref = jax.nn.gelu(x2d @ w1 + b1, approximate=False) @ w2 + b2
    assert out.shape == (8, emb_dim), out.shape
    assert jnp.allclose(out, ref.astype(out.dtype), atol=3e-2, rtol=3e-2), (
        float(jnp.max(jnp.abs(out - ref))))

    print("KERNEL_OK")
</pallas_src>

<mosaic_0001>
module attributes {stable_mosaic.version = 11 : i64} {
  func.func @embed_fc_kernel(%arg0: i32, %arg1: memref<8x32xf32, #tpu.memory_space<vmem>>, %arg2: memref<32x128xbf16, #tpu.memory_space<vmem>>, %arg3: memref<1x128xf32, #tpu.memory_space<vmem>>, %arg4: memref<128x128xbf16, #tpu.memory_space<vmem>>, %arg5: memref<1x128xf32, #tpu.memory_space<vmem>>, %arg6: memref<8x128xf32, #tpu.memory_space<vmem>>) attributes {dimension_semantics = [#tpu.dimension_semantics<parallel>], iteration_bounds = array<i64: 1>, scalar_prefetch = 0 : i64, scratch_operands = 0 : i64, tpu.core_type = #tpu.core_type<tc>, window_params = [{transform_indices = @transform_0, window_bounds = array<i64: 8, 32>}, {pipeline_mode = #tpu.pipeline_mode<synchronous>, transform_indices = @transform_1, window_bounds = array<i64: 32, 128>}, {pipeline_mode = #tpu.pipeline_mode<synchronous>, transform_indices = @transform_2, window_bounds = array<i64: 1, 128>}, {pipeline_mode = #tpu.pipeline_mode<synchronous>, transform_indices = @transform_3, window_bounds = array<i64: 128, 128>}, {pipeline_mode = #tpu.pipeline_mode<synchronous>, transform_indices = @transform_4, window_bounds = array<i64: 1, 128>}, {transform_indices = @transform_5, window_bounds = array<i64: 8, 128>}]} {
    %c0 = arith.constant 0 : index
    %c0_0 = arith.constant 0 : index
    %0 = vector.load %arg1[%c0, %c0_0] : memref<8x32xf32, #tpu.memory_space<vmem>>, vector<8x32xf32>
    %1 = arith.truncf %0 : vector<8x32xf32> to vector<8x32xbf16>
    %c0_1 = arith.constant 0 : index
    %c0_2 = arith.constant 0 : index
    %2 = vector.load %arg2[%c0_1, %c0_2] : memref<32x128xbf16, #tpu.memory_space<vmem>>, vector<32x128xbf16>
    %cst = arith.constant dense<0.000000e+00> : vector<8x128xf32>
    %3 = tpu.matmul %1, %2, %cst {dimension_numbers = #tpu.dot_dimension_numbers<[1], [0], [0], [1], [0, 0, 1, 1], [], []>} : vector<8x32xbf16>, vector<32x128xbf16>, vector<8x128xf32> -> vector<8x128xf32>
    %c0_3 = arith.constant 0 : index
    %c0_4 = arith.constant 0 : index
    %4 = vector.load %arg3[%c0_3, %c0_4] : memref<1x128xf32, #tpu.memory_space<vmem>>, vector<1x128xf32>
    %5 = vector.broadcast %4 : vector<1x128xf32> to vector<8x128xf32>
    %6 = arith.addf %3, %5 : vector<8x128xf32>
    %cst_5 = arith.constant 5.000000e-01 : f32
    %7 = vector.broadcast %cst_5 : f32 to vector<8x128xf32>
    %8 = arith.mulf %7, %6 : vector<8x128xf32>
    %cst_6 = arith.constant 0.707106769 : f32
    %9 = vector.broadcast %cst_6 : f32 to vector<8x128xf32>
    %10 = arith.mulf %6, %9 : vector<8x128xf32>
    %11 = math.erf %10 : vector<8x128xf32>
    %cst_7 = arith.constant 1.000000e+00 : f32
    %12 = vector.broadcast %cst_7 : f32 to vector<8x128xf32>
    %13 = arith.addf %12, %11 : vector<8x128xf32>
    %14 = arith.mulf %8, %13 : vector<8x128xf32>
    %15 = arith.truncf %14 : vector<8x128xf32> to vector<8x128xbf16>
    %c0_8 = arith.constant 0 : index
    %c0_9 = arith.constant 0 : index
    %16 = vector.load %arg4[%c0_8, %c0_9] : memref<128x128xbf16, #tpu.memory_space<vmem>>, vector<128x128xbf16>
    %cst_10 = arith.constant dense<0.000000e+00> : vector<8x128xf32>
    %17 = tpu.matmul %15, %16, %cst_10 {dimension_numbers = #tpu.dot_dimension_numbers<[1], [0], [0], [1], [0, 0, 1, 1], [], []>} : vector<8x128xbf16>, vector<128x128xbf16>, vector<8x128xf32> -> vector<8x128xf32>
    %c0_11 = arith.constant 0 : index
    %c0_12 = arith.constant 0 : index
    %18 = vector.load %arg5[%c0_11, %c0_12] : memref<1x128xf32, #tpu.memory_space<vmem>>, vector<1x128xf32>
    %19 = vector.broadcast %18 : vector<1x128xf32> to vector<8x128xf32>
    %20 = arith.addf %17, %19 : vector<8x128xf32>
    %c0_13 = arith.constant 0 : index
    %c0_14 = arith.constant 0 : index
    %21 = vector.load %arg6[%c0_13, %c0_14] : memref<8x128xf32, #tpu.memory_space<vmem>>, vector<8x128xf32>
    tpu.vector_store %arg6[%c0_13, %c0_14], %20 {strides = array<i32>} : memref<8x128xf32, #tpu.memory_space<vmem>>, vector<8x128xf32>,
    return
  }
  func.func @transform_0(%arg0: i32) -> (i32, i32) {
    %c0_i32 = arith.constant 0 : i32
    %c0_i32_0 = arith.constant 0 : i32
    return %arg0, %c0_i32 : i32, i32
  }
  func.func @transform_1(%arg0: i32) -> (i32, i32) {
    %c0_i32 = arith.constant 0 : i32
    %c0_i32_0 = arith.constant 0 : i32
    %c0_i32_1 = arith.constant 0 : i32
    return %c0_i32, %c0_i32_0 : i32, i32
  }
  func.func @transform_2(%arg0: i32) -> (i32, i32) {
    %c0_i32 = arith.constant 0 : i32
    %c0_i32_0 = arith.constant 0 : i32
    %c0_i32_1 = arith.constant 0 : i32
    return %c0_i32, %c0_i32_0 : i32, i32
  }
  func.func @transform_3(%arg0: i32) -> (i32, i32) {
    %c0_i32 = arith.constant 0 : i32
    %c0_i32_0 = arith.constant 0 : i32
    %c0_i32_1 = arith.constant 0 : i32
    return %c0_i32, %c0_i32_0 : i32, i32
  }
  func.func @transform_4(%arg0: i32) -> (i32, i32) {
    %c0_i32 = arith.constant 0 : i32
    %c0_i32_0 = arith.constant 0 : i32
    %c0_i32_1 = arith.constant 0 : i32
    return %c0_i32, %c0_i32_0 : i32, i32
  }
  func.func @transform_5(%arg0: i32) -> (i32, i32) {
    %c0_i32 = arith.constant 0 : i32
    %c0_i32_0 = arith.constant 0 : i32
    return %arg0, %c0_i32 : i32, i32
  }
}

</mosaic_0001>

<bundles_post_ra>
// kernel: tpu_custom_call.1
= control target key start
LH: loop header
LB: loop body
LE: loop exit
PB: predicated region body
PF: predicated region fallthrough
CT: control target
= control target key end

     0   :  { %10 = vsyncpa [#allocation3], 0  ;;  %s529_s0 = inlined_call_operand.hbm [shape: f32[8,32], index: 0, kind: input, shape index: {}]   ;;  %s530_s1 = inlined_call_operand.hbm [shape: bf16[32,128], index: 1, kind: input, shape index: {}]   ;;  %s531_s2 = inlined_call_operand.vmem [shape: f32[1,128], index: 2, kind: input, shape index: {}]   ;;  %s532_s3 = inlined_call_operand.hbm [shape: bf16[128,128], index: 3, kind: input, shape index: {}]   ;;  %s533_s4 = inlined_call_operand.vmem [shape: f32[1,128], index: 4, kind: input, shape index: {}]   ;;  %s534_s5 = inlined_call_operand.hbm [shape: f32[8,128], index: 5, kind: output, shape index: {}]  }
   0x1   :  { %11 = vsyncpa [#allocation6], 0 }
   0x2   :  { %12 = vsyncpa [#allocation4], 0  ;;  %s431_s18 = smov [#allocation5]   ;;  %s337_s22 = scalar_lea.hbm %s530_s1, 256 }
   0x3   :  { %s28_s19 = sshll.u32 %s431_s18, 4  ;;  %p338_p0 = scmp.ne.s32.totalorder %s530_s1, %s337_s22  ;;  %s29_s19 = int_to_ptr.vmem [resolvable:$true] %s28_s19 }
   0x4   :  { %p341_p1 = scmp.lt.u32.totalorder %s337_s22, %s530_s1 }
   0x6   :  { %p343_p2 = pnand %p341_p1, %p338_p0 }
   0x8   :  { %346 = shalt.err (!%p343_p2)
}
   0x9   :  { %s347_s27 = scalar_lea.vmem %s29_s19, 256  ;;  %p352_p4 = scmp.lt.s32.totalorder %s29_s19, %s29_s19 }
   0xa   :  { %p348_p3 = scmp.ne.s32.totalorder %s29_s19, %s347_s27  ;;  %p353_p5 = scmp.lt.s32.totalorder %s347_s27, %s347_s27 }
   0xc   :  { %p354_p6 = por %p353_p5, %p352_p4 }
   0xe   :  { %p355_p7 = pnand %p354_p6, %p348_p3 }
  0x10   :  { %358 = shalt.err (!%p355_p7)
}
  0x11   :  { %s432_s28 = smov 64   ;;  %s433_s29 = smov 4  }
  0x12   :  { %34 = dma.hbm_to_vmem [thread:$0]  %s530_s1, 256, %s29_s19, [#allocation6], %s432_s28, %s432_s28, %s433_s29  }
  0x13   :  { %s434_s7 = smov [#allocation2]   ;;  %s435_s9 = smov [#allocation7]  }
  0x14   :  { %s19_s8 = sshll.u32 %s434_s7, 4  ;;  %s42_s10 = sshll.u32 %s435_s9, 4  ;;  %s20_s8 = int_to_ptr.vmem [resolvable:$true] %s19_s8  ;;  %s43_s10 = int_to_ptr.vmem [resolvable:$true] %s42_s10 }
  0x15   :  { %s359_s13 = scalar_lea.hbm %s529_s0, 128 }
  0x16   :  { %p360_p8 = scmp.ne.s32.totalorder %s529_s0, %s359_s13  ;;  %p363_p9 = scmp.lt.u32.totalorder %s359_s13, %s529_s0 }
  0x18   :  { %p365_p10 = pnand %p363_p9, %p360_p8 }
  0x1a   :  { %368 = shalt.err (!%p365_p10)
}
  0x1b   :  { %s369_s1 = scalar_lea.vmem %s20_s8, 128  ;;  %p374_p12 = scmp.lt.s32.totalorder %s20_s8, %s20_s8 }
  0x1c   :  { %p370_p11 = scmp.ne.s32.totalorder %s20_s8, %s369_s1  ;;  %p375_p13 = scmp.lt.s32.totalorder %s369_s1, %s369_s1 }
  0x1e   :  { %p376_p0 = por %p375_p13, %p374_p12 }
  0x20   :  { %p377_p1 = pnand %p376_p0, %p370_p11 }
  0x22   :  { %380 = shalt.err (!%p377_p1)
}
  0x23   :  { %22 = dma.hbm_to_vmem [thread:$0]  %s529_s0, 128, %s20_s8, [#allocation3]  }
  0x24   :  { %s381_s22 = scalar_lea.hbm %s532_s3, 1024 }
  0x25   :  { %p382_p2 = scmp.ne.s32.totalorder %s532_s3, %s381_s22  ;;  %p385_p3 = scmp.lt.u32.totalorder %s381_s22, %s532_s3 }
  0x27   :  { %p387_p4 = pnand %p385_p3, %p382_p2 }
  0x29   :  { %390 = shalt.err (!%p387_p4)
}
  0x2a   :  { %s391_s27 = scalar_lea.vmem %s43_s10, 1024  ;;  %p396_p6 = scmp.lt.s32.totalorder %s43_s10, %s43_s10 }
  0x2b   :  { %p392_p5 = scmp.ne.s32.totalorder %s43_s10, %s391_s27  ;;  %p397_p7 = scmp.lt.s32.totalorder %s391_s27, %s391_s27 }
  0x2d   :  { %p398_p8 = por %p397_p7, %p396_p6 }
  0x2f   :  { %p399_p9 = pnand %p398_p8, %p392_p5 }
  0x31   :  { %402 = shalt.err (!%p399_p9)
}
  0x32   :  { %48 = dma.hbm_to_vmem [thread:$0]  %s532_s3, 1024, %s43_s10, [#allocation6], %s432_s28, %s432_s28, %s433_s29  }
  0x33   :  { %425 = dma.done.wait [#allocation3], 128  }
  0x34   :  { %426 = vsyncadd [#allocation3], 4294967168 }
  0x35   :  { %427 = dma.done.wait [#allocation6], 1280  }
  0x36   :  { %428 = vsyncadd [#allocation6], 4294966016  ;;  %v436_v0 = vmov 0.0   ;;  %vm437_vm0 = vmmov 0   ;;  %v325_v1 = vld [vmem:[#allocation5] sm:$0xff]   ;;  %v326_v2 = vld [vmem:[#allocation5 + $0x8] sm:$0xff]  }
  0x37   :  { %289 = vmatprep.subr.bf16.mxu0 %v436_v0  ;;  %293 = vmatprep.mubr.msk.bf16.mxu0 %vm437_vm0, %v436_v0  ;;  %v61_v3 = vld [vmem:[#allocation2] sm:$0xff]  ;;  %v327_v4 = vld [vmem:[#allocation7] sm:$0xff]   ;;  %vm86_vm1 = vcmask 261120   ;;  %v329_v7 = vld [vmem:[#allocation7 + $0x10] sm:$0xff]   ;;  %s438_s7 = smov [#allocation8]  }
  0x38   :  { %297 = vmatprep.subr.bf16.mxu1 %v436_v0  ;;  %313 = vmatprep.mubr.msk.bf16.mxu1 %vm437_vm0, %v436_v0  ;;  %v62_v5 = vpack.c.bf16 %v61_v3, %v61_v3  ;;  %v328_v6 = vld [vmem:[#allocation7 + $0x8] sm:$0xff]   ;;  %v330_v8 = vld [vmem:[#allocation7 + $0x18] sm:$0xff]   ;;  %v331_v9 = vld [vmem:[#allocation7 + $0x20] sm:$0xff]   ;;  %s254_s8 = sshll.u32 %s438_s7, 4  ;;  %s255_s8 = int_to_ptr.vmem [resolvable:$true] %s254_s8 }
  0x39   :  { %290 = vmatpush3.bf16.msra.mxu0 %v325_v1  ;;  %298 = vmatpush3.bf16.msra.mxu1 %v327_v4  ;;  %v332_v10 = vld [vmem:[#allocation7 + $0x28] sm:$0xff]   ;;  %v333_v11 = vld [vmem:[#allocation7 + $0x30] sm:$0xff]   ;;  %v334_v12 = vld [vmem:[#allocation7 + $0x38] sm:$0xff]   ;;  %p408_p11 = scmp.lt.s32.totalorder %s255_s8, %s255_s8 }
  0x3a   :  { %291 = vmatprep.subr.bf16.mxu0 %v436_v0  ;;  %299 = vmatprep.subr.bf16.mxu1 %v436_v0  ;;  %v264_v13 = vld [vmem:[%s531_s2] ss:$0 sm:$0xff]  ;;  %s403_s2 = scalar_lea.vmem %s255_s8, 128 }
  0x3b   :  { %v268_v25 = vld [vmem:[%s533_s4] ss:$0 sm:$0xff]  ;;  %p404_p10 = scmp.ne.s32.totalorder %s255_s8, %s403_s2  ;;  %p409_p12 = scmp.lt.s32.totalorder %s403_s2, %s403_s2 }
  0x3d   :  { %292 = vmatpush3.bf16.msra.mxu0 %v326_v2  ;;  %300 = vmatpush3.bf16.msra.mxu1 %v328_v6  ;;  %p410_p13 = por %p409_p12, %p408_p11 }
  0x3e   :  { %301 = vmatprep.subr.bf16.mxu1 %v436_v0 }
  0x3f   :  { %p411_p0 = pnand %p410_p13, %p404_p10 }
  0x40   :  { %294 = vmatmul.mubr.msk.bf16.vlgmr.msra.gmra.mrb[0].mxu0 %vm86_vm1, %v62_v5 }
  0x41   :  { %302 = vmatpush3.bf16.msra.mxu1 %v329_v7 }
  0x42   :  { %303 = vmatprep.subr.bf16.mxu1 %v436_v0 }
  0x45   :  { %304 = vmatpush3.bf16.msra.mxu1 %v330_v8 }
  0x46   :  { %305 = vmatprep.subr.bf16.mxu1 %v436_v0 }
  0x49   :  { %306 = vmatpush3.bf16.msra.mxu1 %v331_v9 }
  0x4a   :  { %307 = vmatprep.subr.bf16.mxu1 %v436_v0 }
  0x4d   :  { %308 = vmatpush3.bf16.msra.mxu1 %v332_v10 }
  0x4e   :  { %309 = vmatprep.subr.bf16.mxu1 %v436_v0 }
  0x51   :  { %310 = vmatpush3.bf16.msra.mxu1 %v333_v11 }
  0x52   :  { %311 = vmatprep.subr.bf16.mxu1 %v436_v0 }
  0x55   :  { %312 = vmatpush3.bf16.msra.mxu1 %v334_v12 }
 0x113   :  { %v124_v14 = vpop.f32.mrb[0].mxu0 }
 0x114   :  { %v125_v15 = vadd.f32 %v264_v13, %v124_v14  ;;  %v295_v16 = vpop.f32.mrb[1].mxu0 }
 0x115   :  { %v127_v17 = vpop.f32.mrb[2].mxu0 }
 0x116   :  { %v131_v18 = vmul.f32 0.70710677, %v125_v15  ;;  %v296_v19 = vpop.f32.mrb[3].mxu0  ;;  %v130_v21 = vmul.f32 0.5, %v125_v15 }
 0x118   :  { %335 = verf.f32 %v131_v18 }
 0x122   :  { %v336_v20 = vpop.eup %335 }
 0x123   :  { %v133_v22 = vadd.f32 1.0, %v336_v20 }
 0x125   :  { %v134_v23 = vmul.f32 %v133_v22, %v130_v21 }
 0x127   :  { %v135_v24 = vpack.c.bf16 %v134_v23, %v134_v23 }
 0x129   :  { %314 = vmatmul.mubr.bf16.vlgmr.msra.gmra.mrb[0].mxu1 %v135_v24 }
 0x1fc   :  { %v241_v26 = vpop.f32.mrb[0].mxu1 }
 0x1fd   :  { %v242_v27 = vadd.f32 %v268_v25, %v241_v26  ;;  %v315_v28 = vpop.f32.mrb[1].mxu1 }
 0x1fe   :  { %v244_v29 = vpop.f32.mrb[2].mxu1 }
 0x1ff   :  { %247 = vst [vmem:[#allocation8] sm:$0xff] %v242_v27  ;;  %v316_v30 = vpop.f32.mrb[3].mxu1 }
 0x200   :  { %414 = shalt.err (!%p411_p0)
}
 0x201   :  { %s415_s4 = scalar_lea.hbm %s534_s5, 128 }
 0x202   :  { %p416_p1 = scmp.ne.s32.totalorder %s534_s5, %s415_s4  ;;  %p419_p2 = scmp.lt.u32.totalorder %s415_s4, %s534_s5 }
 0x204   :  { %p421_p3 = pnand %p419_p2, %p416_p1 }
 0x206   :  { %424 = shalt.err (!%p421_p3)
}
 0x207   :  { %257 = dma.vmem_to_hbm [thread:$0]  %s255_s8, 128, %s534_s5, [#allocation4]  }
 0x208   :  { %429 = dma.done.wait [#allocation4], 128  }
 0x209   :  { %430 = vsyncadd [#allocation4], 4294967168 }
 0x20a   :  { %261 = vsyncpa [#allocation3], 1 }
 0x20b   :  { %262 = vsyncpa [#allocation6], 1 }
 0x20c   :  { %263 = vsyncpa [#allocation4], 1 }

</bundles_post_ra>
